<compile_context>
chip_gen: v5e
topology: v5e:2x2
jax: 0.10.0
libtpu: 0.0.40
codegen_flags: <defaults>
</compile_context>

<pallas_src>
import functools

import jax
import jax.numpy as jnp
from jax import lax
from jax.experimental import pallas as pl
from jax.experimental.pallas import tpu as pltpu

K_NEIGHBORS = 6
BN_EPS = 1e-5
BIG = 1e30
# Above the 16/32 MiB default scoped limits, below v7x's 64 MiB physical VMEM.
VMEM_LIMIT_BYTES = 48 * 1024 * 1024


def _plan_tiles(n, s):
    """Choose (padded_n, layer0_tile, streaming_tile).

    The layer-0 tile is gated by S because the kNN phase holds several
    [S, tn] f32 temporaries live in VMEM (matters on v7x, 64 MiB).  The
    streaming BN/matmul layers have no [S, tn] temporaries and use a larger
    tile when it divides the padded N (fewer grid steps on v5e/v6e)."""
    if s <= 256:
        t0 = 512
    elif s <= 1024:
        t0 = 256
    else:
        t0 = 128
    if n <= t0:
        return n, n, n                       # single tile, no padding
    n_pad = ((n + t0 - 1) // t0) * t0        # pad N to a multiple of t0
    t1 = t0
    for cand in (2048, 1024):
        if n_pad % cand == 0:
            t1 = cand
            break
    return n_pad, t0, t1


# --------------------------------------------------------------------------
# Kernel 1: pairwise distances + 6-NN inverse-distance interpolation + the
# first 1x1-conv matmul (reassociated).  Emits per-(batch, tile, channel)
# sum / sum-of-squares partials for the one-pass BatchNorm statistics.
# --------------------------------------------------------------------------
def _interp_layer0_kernel(xyz1_ref, xyz2t_ref, p1_ref, wbp2_ref, w0a_ref,
                          h_ref, sum_ref, sq_ref,
                          *, n_valid, tn, mask_tail, k):
    x1 = xyz1_ref[0].astype(jnp.float32)     # [C, tn]   (N in lanes)
    x2t = xyz2t_ref[0].astype(jnp.float32)   # [S, C]
    C = x1.shape[0]
    S = x2t.shape[0]

    # --- pairwise squared distances [S, tn]: direct per-coordinate diff^2 ---
    # (non-negative by construction; robust when xyz2 points coincide with
    #  xyz1 points, unlike the cross-term expansion)
    d = jnp.zeros((S, x1.shape[1]), jnp.float32)
    for c in range(C):
        diff = x2t[:, c:c + 1] - x1[c:c + 1, :]        # [S,1]-[1,tn] -> [S,tn]
        d = d + diff * diff

    # --- k nearest neighbours, inverse-distance weights --------------------
    # First-argmin tie handling matches torch's stable sort()[:, :, :6].
    iota = lax.broadcasted_iota(jnp.int32, (S, 1), 0)
    w = jnp.zeros_like(d)
    norm = jnp.zeros((1, d.shape[1]), jnp.float32)
    for _ in range(k):
        dmin = jnp.min(d, axis=0, keepdims=True)                       # [1,tn]
        is_min = d == dmin
        idx = jnp.min(jnp.where(is_min, iota, S), axis=0, keepdims=True)
        sel = iota == idx                                              # one-hot
        recip = 1.0 / (dmin + 1e-8)                                    # exact
        w = w + jnp.where(sel, recip, 0.0)
        norm = norm + recip
        d = jnp.where(sel, BIG, d)                                     # drop it
    w = w * (1.0 / norm)                                               # exact

    # layer-0 pre-activation: split weight replaces the skip concat; the
    # interpolation matmul is reassociated: (W0b @ points2) @ w.
    h = (jnp.dot(w0a_ref[...], p1_ref[0],
                 preferred_element_type=jnp.float32)
         + jnp.dot(wbp2_ref[0], w.astype(jnp.bfloat16),
                   preferred_element_type=jnp.float32))                # [c0,tn]
    h_ref[0] = h.astype(h_ref.dtype)                                   # bf16

    # per-tile BN partial statistics (folded across tiles in plain JAX)
    if mask_tail:
        col = pl.program_id(1) * tn + lax.broadcasted_iota(jnp.int32, (1, tn), 1)
        m = (col < n_valid).astype(jnp.float32)
        hm = h * m
        sum_ref[0, 0] = jnp.sum(hm, axis=1, keepdims=True)
        sq_ref[0, 0] = jnp.sum(hm * h, axis=1, keepdims=True)
    else:
        sum_ref[0, 0] = jnp.sum(h, axis=1, keepdims=True)
        sq_ref[0, 0] = jnp.sum(h * h, axis=1, keepdims=True)


# --------------------------------------------------------------------------
# Middle layers: fused BN(scale,shift) + ReLU + next 1x1-conv matmul, plus
# per-tile statistics of the new pre-activation.
# --------------------------------------------------------------------------
def _bn_relu_matmul_kernel(h_ref, scale_ref, shift_ref, w_ref,
                           o_ref, sum_ref, sq_ref,
                           *, n_valid, tn, mask_tail):
    x = jnp.maximum(h_ref[0].astype(jnp.float32) * scale_ref[...]
                    + shift_ref[...], 0.0)                             # [Cp,tn]
    y = jnp.dot(w_ref[...], x.astype(jnp.bfloat16),
                preferred_element_type=jnp.float32)                    # [Cn,tn]
    o_ref[0] = y.astype(o_ref.dtype)                                   # bf16

    if mask_tail:
        col = pl.program_id(1) * tn + lax.broadcasted_iota(jnp.int32, (1, tn), 1)
        m = (col < n_valid).astype(jnp.float32)
        ym = y * m
        sum_ref[0, 0] = jnp.sum(ym, axis=1, keepdims=True)
        sq_ref[0, 0] = jnp.sum(ym * y, axis=1, keepdims=True)
    else:
        sum_ref[0, 0] = jnp.sum(y, axis=1, keepdims=True)
        sq_ref[0, 0] = jnp.sum(y * y, axis=1, keepdims=True)


# --------------------------------------------------------------------------
# Last layer: BN(scale,shift) + ReLU only (lane-dense [Cout, tn] f32 store).
# --------------------------------------------------------------------------
def _bn_relu_kernel(h_ref, scale_ref, shift_ref, o_ref):
    o_ref[0] = jnp.maximum(h_ref[0].astype(jnp.float32) * scale_ref[...]
                           + shift_ref[...], 0.0)


def pointnet_fp_forward(xyz1, xyz2, points1, points2, params):
    """Inputs in PyTorch layout: xyz1 [B,C,N], xyz2 [B,C,S], points1 [B,D1,N],
    points2 [B,D2,S]. params = [(conv_w [Co,Ci,1], conv_b [Co], gamma, beta)].
    Returns [B, mlp[-1], N] like the torch module (training-mode BatchNorm)."""
    B, C, N = xyz1.shape
    S = xyz2.shape[2]
    D1 = points1.shape[1]
    D2 = points2.shape[1]
    # TODO(synk): S == 1 branch (broadcast points2) and points1 is None branch
    # are not implemented in the kernel; they are trivial-glue cases.
    assert S > 1 and points1 is not None

    n_pad, tn0, tn1 = _plan_tiles(N, S)
    nt0 = n_pad // tn0
    nt1 = n_pad // tn1
    mask_tail = n_pad != N
    count = jnp.float32(B * N)

    # Parameters: conv weight [Co, Ci, 1] -> [Co, Ci] (channels-first matmul).
    # Conv biases dropped: they cancel exactly under training-mode BN.
    weights = [w[:, :, 0].astype(jnp.float32) for (w, _b, _g, _be) in params]
    gammas = [g.reshape(-1, 1).astype(jnp.float32) for (_w, _b, g, _be) in params]
    betas = [be.reshape(-1, 1).astype(jnp.float32) for (_w, _b, _g, be) in params]
    num_layers = len(params)

    c0 = weights[0].shape[0]
    w0a = weights[0][:, :D1].astype(jnp.bfloat16)          # acts on points1
    # Reassociated interpolation: Wb_P2[b] = W0[:, D1:] @ points2[b]  [B,c0,S]
    wbp2 = jnp.einsum('od,bds->bos', weights[0][:, D1:],
                      points2.astype(jnp.float32)).astype(jnp.bfloat16)

    # Tiny tensor: transpose xyz2 once so the kernel gets per-coordinate
    # columns [S, C] without any in-kernel transpose.
    xyz2_t = jnp.transpose(xyz2, (0, 2, 1)).astype(jnp.float32)

    xyz1_f = xyz1.astype(jnp.float32)
    p1_bf = points1.astype(jnp.bfloat16)
    if mask_tail:
        pad = n_pad - N
        xyz1_f = jnp.pad(xyz1_f, ((0, 0), (0, 0), (0, pad)))
        p1_bf = jnp.pad(p1_bf, ((0, 0), (0, 0), (0, pad)))

    comp_params = pltpu.CompilerParams(
        dimension_semantics=("parallel", "parallel"),
        vmem_limit_bytes=VMEM_LIMIT_BYTES)

    stat_spec = lambda c: pl.BlockSpec((1, 1, c, 1), lambda b, i: (b, i, 0, 0))
    k = min(K_NEIGHBORS, S)

    kern0 = functools.partial(_interp_layer0_kernel,
                              n_valid=N, tn=tn0, mask_tail=mask_tail, k=k)
    h, s1, s2 = pl.pallas_call(
        kern0,
        grid=(B, nt0),
        in_specs=[
            pl.BlockSpec((1, C, tn0), lambda b, i: (b, 0, i)),
            pl.BlockSpec((1, S, C), lambda b, i: (b, 0, 0)),
            pl.BlockSpec((1, D1, tn0), lambda b, i: (b, 0, i)),
            pl.BlockSpec((1, c0, S), lambda b, i: (b, 0, 0)),
            pl.BlockSpec((c0, D1), lambda b, i: (0, 0)),
        ],
        out_specs=[
            pl.BlockSpec((1, c0, tn0), lambda b, i: (b, 0, i)),
            stat_spec(c0),
            stat_spec(c0),
        ],
        out_shape=[
            jax.ShapeDtypeStruct((B, c0, n_pad), jnp.bfloat16),
            jax.ShapeDtypeStruct((B, nt0, c0, 1), jnp.float32),
            jax.ShapeDtypeStruct((B, nt0, c0, 1), jnp.float32),
        ],
        compiler_params=comp_params,
    )(xyz1_f, xyz2_t, p1_bf, wbp2, w0a)

    def fold_bn(sum_b, sq_b, gamma, beta):
        # [C]-sized glue: fold BN (training-mode batch stats) into one FMA.
        s = jnp.sum(sum_b, axis=(0, 1))                   # [C,1]
        q = jnp.sum(sq_b, axis=(0, 1))                    # [C,1]
        mean = s / count
        var = jnp.maximum(q / count - mean * mean, 0.0)   # biased variance
        scale = gamma * lax.rsqrt(var + BN_EPS)
        shift = beta - mean * scale
        return scale, shift

    for li in range(1, num_layers):
        scale, shift = fold_bn(s1, s2, gammas[li - 1], betas[li - 1])
        w_li = weights[li].astype(jnp.bfloat16)           # pre-cast once
        cn, cp = w_li.shape
        kern = functools.partial(_bn_relu_matmul_kernel,
                                 n_valid=N, tn=tn1, mask_tail=mask_tail)
        h, s1, s2 = pl.pallas_call(
            kern,
            grid=(B, nt1),
            in_specs=[
                pl.BlockSpec((1, cp, tn1), lambda b, i: (b, 0, i)),
                pl.BlockSpec((cp, 1), lambda b, i: (0, 0)),
                pl.BlockSpec((cp, 1), lambda b, i: (0, 0)),
                pl.BlockSpec((cn, cp), lambda b, i: (0, 0)),
            ],
            out_specs=[
                pl.BlockSpec((1, cn, tn1), lambda b, i: (b, 0, i)),
                stat_spec(cn),
                stat_spec(cn),
            ],
            out_shape=[
                jax.ShapeDtypeStruct((B, cn, n_pad), jnp.bfloat16),
                jax.ShapeDtypeStruct((B, nt1, cn, 1), jnp.float32),
                jax.ShapeDtypeStruct((B, nt1, cn, 1), jnp.float32),
            ],
            compiler_params=comp_params,
        )(h, scale, shift, w_li)

    # final BN + ReLU (lane-dense channels-first f32 output)
    scale, shift = fold_bn(s1, s2, gammas[-1], betas[-1])
    c_last = weights[-1].shape[0]
    out = pl.pallas_call(
        _bn_relu_kernel,
        grid=(B, nt1),
        in_specs=[
            pl.BlockSpec((1, c_last, tn1), lambda b, i: (b, 0, i)),
            pl.BlockSpec((c_last, 1), lambda b, i: (0, 0)),
            pl.BlockSpec((c_last, 1), lambda b, i: (0, 0)),
        ],
        out_specs=pl.BlockSpec((1, c_last, tn1), lambda b, i: (b, 0, i)),
        out_shape=jax.ShapeDtypeStruct((B, c_last, n_pad), jnp.float32),
        compiler_params=comp_params,
    )(h, scale, shift)

    return out[:, :, :N]  # [B, mlp[-1], N]


def _reference_forward(xyz1, xyz2, points1, points2, params):
    """Pure-JAX port of the torch module (training-mode BatchNorm)."""
    x1 = jnp.transpose(xyz1, (0, 2, 1))       # [B,N,3]
    x2 = jnp.transpose(xyz2, (0, 2, 1))       # [B,S,3]
    p2 = jnp.transpose(points2, (0, 2, 1))    # [B,S,D2]
    d = jnp.sum((x1[:, :, None, :] - x2[:, None, :, :]) ** 2, axis=-1)
    k = min(K_NEIGHBORS, d.shape[-1])
    idx = jnp.argsort(d, axis=-1)[:, :, :k]
    dk = jnp.take_along_axis(d, idx, axis=-1)
    recip = 1.0 / (dk + 1e-8)
    weight = recip / jnp.sum(recip, axis=-1, keepdims=True)
    gathered = jax.vmap(lambda pts, ind: pts[ind])(p2, idx)        # [B,N,k,D2]
    interp = jnp.sum(gathered * weight[..., None], axis=2)         # [B,N,D2]
    p1 = jnp.transpose(points1, (0, 2, 1))
    x = jnp.transpose(jnp.concatenate([p1, interp], axis=-1), (0, 2, 1))
    for (w, b, gamma, beta) in params:
        y = jnp.einsum('oc,bcn->bon', w[:, :, 0], x) + b[None, :, None]
        mean = jnp.mean(y, axis=(0, 2), keepdims=True)
        var = jnp.mean((y - mean) ** 2, axis=(0, 2), keepdims=True)
        y = (gamma[None, :, None] * (y - mean) * lax.rsqrt(var + BN_EPS)
             + beta[None, :, None])
        x = jnp.maximum(y, 0.0)
    return x


if __name__ == "__main__":
    key = jax.random.PRNGKey(0)
    B, C, N, S = 2, 3, 128, 16
    D1, D2 = 8, 16
    mlp = [32, 32]

    keys = jax.random.split(key, 4 + 2 * len(mlp))
    xyz1 = jax.random.normal(keys[0], (B, C, N), jnp.float32)
    xyz2 = jax.random.normal(keys[1], (B, C, S), jnp.float32)
    points1 = jax.random.normal(keys[2], (B, D1, N), jnp.float32)
    points2 = jax.random.normal(keys[3], (B, D2, S), jnp.float32)

    in_channel = D1 + D2
    params = []
    last = in_channel
    kidx = 4
    for out_ch in mlp:
        w = 0.1 * jax.random.normal(keys[kidx], (out_ch, last, 1), jnp.float32)
        kidx += 1
        b = 0.1 * jax.random.normal(keys[kidx], (out_ch,), jnp.float32)
        kidx += 1
        gamma = jnp.ones((out_ch,), jnp.float32)
        beta = jnp.zeros((out_ch,), jnp.float32)
        params.append((w, b, gamma, beta))
        last = out_ch

    out = pointnet_fp_forward(xyz1, xyz2, points1, points2, params)
    out = jax.block_until_ready(out)
    assert out.shape == (B, mlp[-1], N), out.shape
    assert bool(jnp.all(jnp.isfinite(out)))

    ref = _reference_forward(xyz1, xyz2, points1, points2, params)
    err = float(jnp.max(jnp.abs(out - ref)))
    assert err < 1e-1, f"max abs err vs reference: {err}"
    print("KERNEL_OK")
</pallas_src>

<mosaic_0001>
module attributes {stable_mosaic.version = 11 : i64} {
  func.func @_interp_layer0_kernel(%arg0: i32, %arg1: i32, %arg2: memref<1x3x128xf32, #tpu.memory_space<vmem>>, %arg3: memref<1x16x3xf32, #tpu.memory_space<vmem>>, %arg4: memref<1x8x128xbf16, #tpu.memory_space<vmem>>, %arg5: memref<1x32x16xbf16, #tpu.memory_space<vmem>>, %arg6: memref<32x8xbf16, #tpu.memory_space<vmem>>, %arg7: memref<1x32x128xbf16, #tpu.memory_space<vmem>>, %arg8: memref<1x1x32x1xf32, #tpu.memory_space<vmem>>, %arg9: memref<1x1x32x1xf32, #tpu.memory_space<vmem>>) attributes {dimension_semantics = [#tpu.dimension_semantics<parallel>, #tpu.dimension_semantics<parallel>], iteration_bounds = array<i64: 2, 1>, scalar_prefetch = 0 : i64, scratch_operands = 0 : i64, tpu.core_type = #tpu.core_type<tc>, window_params = [{transform_indices = @transform_0, window_bounds = array<i64: 1, 3, 128>}, {transform_indices = @transform_1, window_bounds = array<i64: 1, 16, 3>}, {transform_indices = @transform_2, window_bounds = array<i64: 1, 8, 128>}, {transform_indices = @transform_3, window_bounds = array<i64: 1, 32, 16>}, {pipeline_mode = #tpu.pipeline_mode<synchronous>, transform_indices = @transform_4, window_bounds = array<i64: 32, 8>}, {transform_indices = @transform_5, window_bounds = array<i64: 1, 32, 128>}, {transform_indices = @transform_6, window_bounds = array<i64: 1, 1, 32, 1>}, {transform_indices = @transform_7, window_bounds = array<i64: 1, 1, 32, 1>}]} {
    %c0 = arith.constant 0 : index
    %c0_0 = arith.constant 0 : index
    %c0_1 = arith.constant 0 : index
    %0 = vector.load %arg2[%c0, %c0_0, %c0_1] : memref<1x3x128xf32, #tpu.memory_space<vmem>>, vector<1x3x128xf32>
    %1 = vector.shape_cast %0 : vector<1x3x128xf32> to vector<3x128xf32>
    %c0_2 = arith.constant 0 : index
    %c0_3 = arith.constant 0 : index
    %c0_4 = arith.constant 0 : index
    %2 = vector.load %arg3[%c0_2, %c0_3, %c0_4] : memref<1x16x3xf32, #tpu.memory_space<vmem>>, vector<1x16x3xf32>
    %3 = vector.shape_cast %2 : vector<1x16x3xf32> to vector<16x3xf32>
    %cst = arith.constant 0.000000e+00 : f32
    %4 = vector.broadcast %cst : f32 to vector<16x128xf32>
    %5 = vector.extract_strided_slice %3 {offsets = [0, 0], sizes = [16, 1], strides = [1, 1]} : vector<16x3xf32> to vector<16x1xf32>
    %6 = vector.extract_strided_slice %1 {offsets = [0, 0], sizes = [1, 128], strides = [1, 1]} : vector<3x128xf32> to vector<1x128xf32>
    %7 = vector.broadcast %5 : vector<16x1xf32> to vector<16x128xf32>
    %8 = vector.broadcast %6 : vector<1x128xf32> to vector<16x128xf32>
    %9 = arith.subf %7, %8 : vector<16x128xf32>
    %10 = arith.mulf %9, %9 : vector<16x128xf32>
    %11 = arith.addf %4, %10 : vector<16x128xf32>
    %12 = vector.extract_strided_slice %3 {offsets = [0, 1], sizes = [16, 1], strides = [1, 1]} : vector<16x3xf32> to vector<16x1xf32>
    %13 = vector.extract_strided_slice %1 {offsets = [1, 0], sizes = [1, 128], strides = [1, 1]} : vector<3x128xf32> to vector<1x128xf32>
    %14 = vector.broadcast %12 : vector<16x1xf32> to vector<16x128xf32>
    %15 = vector.broadcast %13 : vector<1x128xf32> to vector<16x128xf32>
    %16 = arith.subf %14, %15 : vector<16x128xf32>
    %17 = arith.mulf %16, %16 : vector<16x128xf32>
    %18 = arith.addf %11, %17 : vector<16x128xf32>
    %19 = vector.extract_strided_slice %3 {offsets = [0, 2], sizes = [16, 1], strides = [1, 1]} : vector<16x3xf32> to vector<16x1xf32>
    %20 = vector.extract_strided_slice %1 {offsets = [2, 0], sizes = [1, 128], strides = [1, 1]} : vector<3x128xf32> to vector<1x128xf32>
    %21 = vector.broadcast %19 : vector<16x1xf32> to vector<16x128xf32>
    %22 = vector.broadcast %20 : vector<1x128xf32> to vector<16x128xf32>
    %23 = arith.subf %21, %22 : vector<16x128xf32>
    %24 = arith.mulf %23, %23 : vector<16x128xf32>
    %25 = arith.addf %18, %24 : vector<16x128xf32>
    %26 = tpu.iota {dimensions = array<i32: 0>} : vector<16x1xi32>
    %cst_5 = arith.constant 0.000000e+00 : f32
    %27 = vector.broadcast %cst_5 : f32 to vector<16x128xf32>
    %cst_6 = arith.constant 0.000000e+00 : f32
    %28 = vector.broadcast %cst_6 : f32 to vector<1x128xf32>
    %cst_7 = arith.constant dense<0x7F800000> : vector<128xf32>
    %29 = vector.multi_reduction <minimumf>, %25, %cst_7 [0] : vector<16x128xf32> to vector<128xf32>
    %30 = vector.shape_cast %29 : vector<128xf32> to vector<1x128xf32>
    %31 = vector.broadcast %30 : vector<1x128xf32> to vector<16x128xf32>
    %32 = arith.cmpf oeq, %25, %31 : vector<16x128xf32>
    %c16_i32 = arith.constant 16 : i32
    %33 = vector.shape_cast %26 : vector<16x1xi32> to vector<16x1xi32>
    %34 = vector.broadcast %33 : vector<16x1xi32> to vector<16x128xi32>
    %35 = vector.broadcast %c16_i32 : i32 to vector<16x128xi32>
    %36 = arith.select %32, %34, %35 : vector<16x128xi1>, vector<16x128xi32>
    %cst_8 = arith.constant dense<2147483647> : vector<128xi32>
    %37 = vector.multi_reduction <minsi>, %36, %cst_8 [0] : vector<16x128xi32> to vector<128xi32>
    %38 = vector.shape_cast %37 : vector<128xi32> to vector<1x128xi32>
    %39 = vector.broadcast %26 : vector<16x1xi32> to vector<16x128xi32>
    %40 = vector.broadcast %38 : vector<1x128xi32> to vector<16x128xi32>
    %41 = arith.cmpi eq, %39, %40 : vector<16x128xi32>
    %cst_9 = arith.constant 9.99999993E-9 : f32
    %42 = vector.broadcast %cst_9 : f32 to vector<1x128xf32>
    %43 = arith.addf %30, %42 : vector<1x128xf32>
    %cst_10 = arith.constant 1.000000e+00 : f32
    %44 = vector.broadcast %cst_10 : f32 to vector<1x128xf32>
    %45 = arith.divf %44, %43 : vector<1x128xf32>
    %cst_11 = arith.constant 0.000000e+00 : f32
    %46 = vector.shape_cast %45 : vector<1x128xf32> to vector<1x128xf32>
    %47 = vector.broadcast %46 : vector<1x128xf32> to vector<16x128xf32>
    %48 = vector.broadcast %cst_11 : f32 to vector<16x128xf32>
    %49 = arith.select %41, %47, %48 : vector<16x128xi1>, vector<16x128xf32>
    %50 = arith.addf %27, %49 : vector<16x128xf32>
    %51 = arith.addf %28, %45 : vector<1x128xf32>
    %cst_12 = arith.constant 1.000000e+30 : f32
    %52 = vector.broadcast %cst_12 : f32 to vector<16x128xf32>
    %53 = arith.select %41, %52, %25 : vector<16x128xi1>, vector<16x128xf32>
    %cst_13 = arith.constant dense<0x7F800000> : vector<128xf32>
    %54 = vector.multi_reduction <minimumf>, %53, %cst_13 [0] : vector<16x128xf32> to vector<128xf32>
    %55 = vector.shape_cast %54 : vector<128xf32> to vector<1x128xf32>
    %56 = vector.broadcast %55 : vector<1x128xf32> to vector<16x128xf32>
    %57 = arith.cmpf oeq, %53, %56 : vector<16x128xf32>
    %c16_i32_14 = arith.constant 16 : i32
    %58 = vector.shape_cast %26 : vector<16x1xi32> to vector<16x1xi32>
    %59 = vector.broadcast %58 : vector<16x1xi32> to vector<16x128xi32>
    %60 = vector.broadcast %c16_i32_14 : i32 to vector<16x128xi32>
    %61 = arith.select %57, %59, %60 : vector<16x128xi1>, vector<16x128xi32>
    %cst_15 = arith.constant dense<2147483647> : vector<128xi32>
    %62 = vector.multi_reduction <minsi>, %61, %cst_15 [0] : vector<16x128xi32> to vector<128xi32>
    %63 = vector.shape_cast %62 : vector<128xi32> to vector<1x128xi32>
    %64 = vector.broadcast %26 : vector<16x1xi32> to vector<16x128xi32>
    %65 = vector.broadcast %63 : vector<1x128xi32> to vector<16x128xi32>
    %66 = arith.cmpi eq, %64, %65 : vector<16x128xi32>
    %cst_16 = arith.constant 9.99999993E-9 : f32
    %67 = vector.broadcast %cst_16 : f32 to vector<1x128xf32>
    %68 = arith.addf %55, %67 : vector<1x128xf32>
    %cst_17 = arith.constant 1.000000e+00 : f32
    %69 = vector.broadcast %cst_17 : f32 to vector<1x128xf32>
    %70 = arith.divf %69, %68 : vector<1x128xf32>
    %cst_18 = arith.constant 0.000000e+00 : f32
    %71 = vector.shape_cast %70 : vector<1x128xf32> to vector<1x128xf32>
    %72 = vector.broadcast %71 : vector<1x128xf32> to vector<16x128xf32>
    %73 = vector.broadcast %cst_18 : f32 to vector<16x128xf32>
    %74 = arith.select %66, %72, %73 : vector<16x128xi1>, vector<16x128xf32>
    %75 = arith.addf %50, %74 : vector<16x128xf32>
    %76 = arith.addf %51, %70 : vector<1x128xf32>
    %cst_19 = arith.constant 1.000000e+30 : f32
    %77 = vector.broadcast %cst_19 : f32 to vector<16x128xf32>
    %78 = arith.select %66, %77, %53 : vector<16x128xi1>, vector<16x128xf32>
    %cst_20 = arith.constant dense<0x7F800000> : vector<128xf32>
    %79 = vector.multi_reduction <minimumf>, %78, %cst_20 [0] : vector<16x128xf32> to vector<128xf32>
    %80 = vector.shape_cast %79 : vector<128xf32> to vector<1x128xf32>
    %81 = vector.broadcast %80 : vector<1x128xf32> to vector<16x128xf32>
    %82 = arith.cmpf oeq, %78, %81 : vector<16x128xf32>
    %c16_i32_21 = arith.constant 16 : i32
    %83 = vector.shape_cast %26 : vector<16x1xi32> to vector<16x1xi32>
    %84 = vector.broadcast %83 : vector<16x1xi32> to vector<16x128xi32>
    %85 = vector.broadcast %c16_i32_21 : i32 to vector<16x128xi32>
    %86 = arith.select %82, %84, %85 : vector<16x128xi1>, vector<16x128xi32>
    %cst_22 = arith.constant dense<2147483647> : vector<128xi32>
    %87 = vector.multi_reduction <minsi>, %86, %cst_22 [0] : vector<16x128xi32> to vector<128xi32>
    %88 = vector.shape_cast %87 : vector<128xi32> to vector<1x128xi32>
    %89 = vector.broadcast %26 : vector<16x1xi32> to vector<16x128xi32>
    %90 = vector.broadcast %88 : vector<1x128xi32> to vector<16x128xi32>
    %91 = arith.cmpi eq, %89, %90 : vector<16x128xi32>
    %cst_23 = arith.constant 9.99999993E-9 : f32
    %92 = vector.broadcast %cst_23 : f32 to vector<1x128xf32>
    %93 = arith.addf %80, %92 : vector<1x128xf32>
    %cst_24 = arith.constant 1.000000e+00 : f32
    %94 = vector.broadcast %cst_24 : f32 to vector<1x128xf32>
    %95 = arith.divf %94, %93 : vector<1x128xf32>
    %cst_25 = arith.constant 0.000000e+00 : f32
    %96 = vector.shape_cast %95 : vector<1x128xf32> to vector<1x128xf32>
    %97 = vector.broadcast %96 : vector<1x128xf32> to vector<16x128xf32>
    %98 = vector.broadcast %cst_25 : f32 to vector<16x128xf32>
    %99 = arith.select %91, %97, %98 : vector<16x128xi1>, vector<16x128xf32>
    %100 = arith.addf %75, %99 : vector<16x128xf32>
    %101 = arith.addf %76, %95 : vector<1x128xf32>
    %cst_26 = arith.constant 1.000000e+30 : f32
    %102 = vector.broadcast %cst_26 : f32 to vector<16x128xf32>
    %103 = arith.select %91, %102, %78 : vector<16x128xi1>, vector<16x128xf32>
    %cst_27 = arith.constant dense<0x7F800000> : vector<128xf32>
    %104 = vector.multi_reduction <minimumf>, %103, %cst_27 [0] : vector<16x128xf32> to vector<128xf32>
    %105 = vector.shape_cast %104 : vector<128xf32> to vector<1x128xf32>
    %106 = vector.broadcast %105 : vector<1x128xf32> to vector<16x128xf32>
    %107 = arith.cmpf oeq, %103, %106 : vector<16x128xf32>
    %c16_i32_28 = arith.constant 16 : i32
    %108 = vector.shape_cast %26 : vector<16x1xi32> to vector<16x1xi32>
    %109 = vector.broadcast %108 : vector<16x1xi32> to vector<16x128xi32>
    %110 = vector.broadcast %c16_i32_28 : i32 to vector<16x128xi32>
    %111 = arith.select %107, %109, %110 : vector<16x128xi1>, vector<16x128xi32>
    %cst_29 = arith.constant dense<2147483647> : vector<128xi32>
    %112 = vector.multi_reduction <minsi>, %111, %cst_29 [0] : vector<16x128xi32> to vector<128xi32>
    %113 = vector.shape_cast %112 : vector<128xi32> to vector<1x128xi32>
    %114 = vector.broadcast %26 : vector<16x1xi32> to vector<16x128xi32>
    %115 = vector.broadcast %113 : vector<1x128xi32> to vector<16x128xi32>
    %116 = arith.cmpi eq, %114, %115 : vector<16x128xi32>
    %cst_30 = arith.constant 9.99999993E-9 : f32
    %117 = vector.broadcast %cst_30 : f32 to vector<1x128xf32>
    %118 = arith.addf %105, %117 : vector<1x128xf32>
    %cst_31 = arith.constant 1.000000e+00 : f32
    %119 = vector.broadcast %cst_31 : f32 to vector<1x128xf32>
    %120 = arith.divf %119, %118 : vector<1x128xf32>
    %cst_32 = arith.constant 0.000000e+00 : f32
    %121 = vector.shape_cast %120 : vector<1x128xf32> to vector<1x128xf32>
    %122 = vector.broadcast %121 : vector<1x128xf32> to vector<16x128xf32>
    %123 = vector.broadcast %cst_32 : f32 to vector<16x128xf32>
    %124 = arith.select %116, %122, %123 : vector<16x128xi1>, vector<16x128xf32>
    %125 = arith.addf %100, %124 : vector<16x128xf32>
    %126 = arith.addf %101, %120 : vector<1x128xf32>
    %cst_33 = arith.constant 1.000000e+30 : f32
    %127 = vector.broadcast %cst_33 : f32 to vector<16x128xf32>
    %128 = arith.select %116, %127, %103 : vector<16x128xi1>, vector<16x128xf32>
    %cst_34 = arith.constant dense<0x7F800000> : vector<128xf32>
    %129 = vector.multi_reduction <minimumf>, %128, %cst_34 [0] : vector<16x128xf32> to vector<128xf32>
    %130 = vector.shape_cast %129 : vector<128xf32> to vector<1x128xf32>
    %131 = vector.broadcast %130 : vector<1x128xf32> to vector<16x128xf32>
    %132 = arith.cmpf oeq, %128, %131 : vector<16x128xf32>
    %c16_i32_35 = arith.constant 16 : i32
    %133 = vector.shape_cast %26 : vector<16x1xi32> to vector<16x1xi32>
    %134 = vector.broadcast %133 : vector<16x1xi32> to vector<16x128xi32>
    %135 = vector.broadcast %c16_i32_35 : i32 to vector<16x128xi32>
    %136 = arith.select %132, %134, %135 : vector<16x128xi1>, vector<16x128xi32>
    %cst_36 = arith.constant dense<2147483647> : vector<128xi32>
    %137 = vector.multi_reduction <minsi>, %136, %cst_36 [0] : vector<16x128xi32> to vector<128xi32>
    %138 = vector.shape_cast %137 : vector<128xi32> to vector<1x128xi32>
    %139 = vector.broadcast %26 : vector<16x1xi32> to vector<16x128xi32>
    %140 = vector.broadcast %138 : vector<1x128xi32> to vector<16x128xi32>
    %141 = arith.cmpi eq, %139, %140 : vector<16x128xi32>
    %cst_37 = arith.constant 9.99999993E-9 : f32
    %142 = vector.broadcast %cst_37 : f32 to vector<1x128xf32>
    %143 = arith.addf %130, %142 : vector<1x128xf32>
    %cst_38 = arith.constant 1.000000e+00 : f32
    %144 = vector.broadcast %cst_38 : f32 to vector<1x128xf32>
    %145 = arith.divf %144, %143 : vector<1x128xf32>
    %cst_39 = arith.constant 0.000000e+00 : f32
    %146 = vector.shape_cast %145 : vector<1x128xf32> to vector<1x128xf32>
    %147 = vector.broadcast %146 : vector<1x128xf32> to vector<16x128xf32>
    %148 = vector.broadcast %cst_39 : f32 to vector<16x128xf32>
    %149 = arith.select %141, %147, %148 : vector<16x128xi1>, vector<16x128xf32>
    %150 = arith.addf %125, %149 : vector<16x128xf32>
    %151 = arith.addf %126, %145 : vector<1x128xf32>
    %cst_40 = arith.constant 1.000000e+30 : f32
    %152 = vector.broadcast %cst_40 : f32 to vector<16x128xf32>
    %153 = arith.select %141, %152, %128 : vector<16x128xi1>, vector<16x128xf32>
    %cst_41 = arith.constant dense<0x7F800000> : vector<128xf32>
    %154 = vector.multi_reduction <minimumf>, %153, %cst_41 [0] : vector<16x128xf32> to vector<128xf32>
    %155 = vector.shape_cast %154 : vector<128xf32> to vector<1x128xf32>
    %156 = vector.broadcast %155 : vector<1x128xf32> to vector<16x128xf32>
    %157 = arith.cmpf oeq, %153, %156 : vector<16x128xf32>
    %c16_i32_42 = arith.constant 16 : i32
    %158 = vector.shape_cast %26 : vector<16x1xi32> to vector<16x1xi32>
    %159 = vector.broadcast %158 : vector<16x1xi32> to vector<16x128xi32>
    %160 = vector.broadcast %c16_i32_42 : i32 to vector<16x128xi32>
    %161 = arith.select %157, %159, %160 : vector<16x128xi1>, vector<16x128xi32>
    %cst_43 = arith.constant dense<2147483647> : vector<128xi32>
    %162 = vector.multi_reduction <minsi>, %161, %cst_43 [0] : vector<16x128xi32> to vector<128xi32>
    %163 = vector.shape_cast %162 : vector<128xi32> to vector<1x128xi32>
    %164 = vector.broadcast %26 : vector<16x1xi32> to vector<16x128xi32>
    %165 = vector.broadcast %163 : vector<1x128xi32> to vector<16x128xi32>
    %166 = arith.cmpi eq, %164, %165 : vector<16x128xi32>
    %cst_44 = arith.constant 9.99999993E-9 : f32
    %167 = vector.broadcast %cst_44 : f32 to vector<1x128xf32>
    %168 = arith.addf %155, %167 : vector<1x128xf32>
    %cst_45 = arith.constant 1.000000e+00 : f32
    %169 = vector.broadcast %cst_45 : f32 to vector<1x128xf32>
    %170 = arith.divf %169, %168 : vector<1x128xf32>
    %cst_46 = arith.constant 0.000000e+00 : f32
    %171 = vector.shape_cast %170 : vector<1x128xf32> to vector<1x128xf32>
    %172 = vector.broadcast %171 : vector<1x128xf32> to vector<16x128xf32>
    %173 = vector.broadcast %cst_46 : f32 to vector<16x128xf32>
    %174 = arith.select %166, %172, %173 : vector<16x128xi1>, vector<16x128xf32>
    %175 = arith.addf %150, %174 : vector<16x128xf32>
    %176 = arith.addf %151, %170 : vector<1x128xf32>
    %cst_47 = arith.constant 1.000000e+00 : f32
    %177 = vector.broadcast %cst_47 : f32 to vector<1x128xf32>
    %178 = arith.divf %177, %176 : vector<1x128xf32>
    %179 = vector.broadcast %178 : vector<1x128xf32> to vector<16x128xf32>
    %180 = arith.mulf %175, %179 : vector<16x128xf32>
    %c0_48 = arith.constant 0 : index
    %c0_49 = arith.constant 0 : index
    %181 = vector.load %arg6[%c0_48, %c0_49] : memref<32x8xbf16, #tpu.memory_space<vmem>>, vector<32x8xbf16>
    %c0_50 = arith.constant 0 : index
    %c0_51 = arith.constant 0 : index
    %c0_52 = arith.constant 0 : index
    %182 = vector.load %arg4[%c0_50, %c0_51, %c0_52] : memref<1x8x128xbf16, #tpu.memory_space<vmem>>, vector<1x8x128xbf16>
    %183 = vector.shape_cast %182 : vector<1x8x128xbf16> to vector<8x128xbf16>
    %cst_53 = arith.constant dense<0.000000e+00> : vector<32x128xf32>
    %184 = tpu.matmul %181, %183, %cst_53 {dimension_numbers = #tpu.dot_dimension_numbers<[1], [0], [0], [1], [0, 0, 1, 1], [], []>} : vector<32x8xbf16>, vector<8x128xbf16>, vector<32x128xf32> -> vector<32x128xf32>
    %c0_54 = arith.constant 0 : index
    %c0_55 = arith.constant 0 : index
    %c0_56 = arith.constant 0 : index
    %185 = vector.load %arg5[%c0_54, %c0_55, %c0_56] : memref<1x32x16xbf16, #tpu.memory_space<vmem>>, vector<1x32x16xbf16>
    %186 = vector.shape_cast %185 : vector<1x32x16xbf16> to vector<32x16xbf16>
    %187 = arith.truncf %180 : vector<16x128xf32> to vector<16x128xbf16>
    %cst_57 = arith.constant dense<0.000000e+00> : vector<32x128xf32>
    %188 = tpu.matmul %186, %187, %cst_57 {dimension_numbers = #tpu.dot_dimension_numbers<[1], [0], [0], [1], [0, 0, 1, 1], [], []>} : vector<32x16xbf16>, vector<16x128xbf16>, vector<32x128xf32> -> vector<32x128xf32>
    %189 = arith.addf %184, %188 : vector<32x128xf32>
    %190 = arith.truncf %189 : vector<32x128xf32> to vector<32x128xbf16>
    %c0_58 = arith.constant 0 : index
    %c0_59 = arith.constant 0 : index
    %c0_60 = arith.constant 0 : index
    %191 = vector.load %arg7[%c0_58, %c0_59, %c0_60] : memref<1x32x128xbf16, #tpu.memory_space<vmem>>, vector<1x32x128xbf16>
    %192 = vector.shape_cast %191 : vector<1x32x128xbf16> to vector<32x128xbf16>
    %193 = vector.shape_cast %190 : vector<32x128xbf16> to vector<1x32x128xbf16>
    tpu.vector_store %arg7[%c0_58, %c0_59, %c0_60], %193 {strides = array<i32>} : memref<1x32x128xbf16, #tpu.memory_space<vmem>>, vector<1x32x128xbf16>,
    %cst_61 = arith.constant dense<0.000000e+00> : vector<32xf32>
    %194 = vector.multi_reduction <add>, %189, %cst_61 [1] : vector<32x128xf32> to vector<32xf32>
    %195 = vector.shape_cast %194 : vector<32xf32> to vector<32x1xf32>
    %c0_62 = arith.constant 0 : index
    %c0_63 = arith.constant 0 : index
    %c0_64 = arith.constant 0 : index
    %c0_65 = arith.constant 0 : index
    %196 = vector.load %arg8[%c0_62, %c0_63, %c0_64, %c0_65] : memref<1x1x32x1xf32, #tpu.memory_space<vmem>>, vector<1x1x32x1xf32>
    %197 = vector.shape_cast %196 : vector<1x1x32x1xf32> to vector<32x1xf32>
    %198 = vector.shape_cast %195 : vector<32x1xf32> to vector<1x1x32x1xf32>
    tpu.vector_store %arg8[%c0_62, %c0_63, %c0_64, %c0_65], %198 {strides = array<i32>} : memref<1x1x32x1xf32, #tpu.memory_space<vmem>>, vector<1x1x32x1xf32>,
    %199 = arith.mulf %189, %189 : vector<32x128xf32>
    %cst_66 = arith.constant dense<0.000000e+00> : vector<32xf32>
    %200 = vector.multi_reduction <add>, %199, %cst_66 [1] : vector<32x128xf32> to vector<32xf32>
    %201 = vector.shape_cast %200 : vector<32xf32> to vector<32x1xf32>
    %c0_67 = arith.constant 0 : index
    %c0_68 = arith.constant 0 : index
    %c0_69 = arith.constant 0 : index
    %c0_70 = arith.constant 0 : index
    %202 = vector.load %arg9[%c0_67, %c0_68, %c0_69, %c0_70] : memref<1x1x32x1xf32, #tpu.memory_space<vmem>>, vector<1x1x32x1xf32>
    %203 = vector.shape_cast %202 : vector<1x1x32x1xf32> to vector<32x1xf32>
    %204 = vector.shape_cast %201 : vector<32x1xf32> to vector<1x1x32x1xf32>
    tpu.vector_store %arg9[%c0_67, %c0_68, %c0_69, %c0_70], %204 {strides = array<i32>} : memref<1x1x32x1xf32, #tpu.memory_space<vmem>>, vector<1x1x32x1xf32>,
    return
  }
  func.func @transform_0(%arg0: i32, %arg1: i32) -> (i32, i32, i32) {
    %c0_i32 = arith.constant 0 : i32
    %c0_i32_0 = arith.constant 0 : i32
    return %arg0, %c0_i32, %arg1 : i32, i32, i32
  }
  func.func @transform_1(%arg0: i32, %arg1: i32) -> (i32, i32, i32) {
    %c0_i32 = arith.constant 0 : i32
    %c0_i32_0 = arith.constant 0 : i32
    %c0_i32_1 = arith.constant 0 : i32
    return %arg0, %c0_i32, %c0_i32_0 : i32, i32, i32
  }
  func.func @transform_2(%arg0: i32, %arg1: i32) -> (i32, i32, i32) {
    %c0_i32 = arith.constant 0 : i32
    %c0_i32_0 = arith.constant 0 : i32
    return %arg0, %c0_i32, %arg1 : i32, i32, i32
  }
  func.func @transform_3(%arg0: i32, %arg1: i32) -> (i32, i32, i32) {
    %c0_i32 = arith.constant 0 : i32
    %c0_i32_0 = arith.constant 0 : i32
    %c0_i32_1 = arith.constant 0 : i32
    return %arg0, %c0_i32, %c0_i32_0 : i32, i32, i32
  }
  func.func @transform_4(%arg0: i32, %arg1: i32) -> (i32, i32) {
    %c0_i32 = arith.constant 0 : i32
    %c0_i32_0 = arith.constant 0 : i32
    %c0_i32_1 = arith.constant 0 : i32
    return %c0_i32, %c0_i32_0 : i32, i32
  }
  func.func @transform_5(%arg0: i32, %arg1: i32) -> (i32, i32, i32) {
    %c0_i32 = arith.constant 0 : i32
    %c0_i32_0 = arith.constant 0 : i32
    return %arg0, %c0_i32, %arg1 : i32, i32, i32
  }
  func.func @transform_6(%arg0: i32, %arg1: i32) -> (i32, i32, i32, i32) {
    %c0_i32 = arith.constant 0 : i32
    %c0_i32_0 = arith.constant 0 : i32
    %c0_i32_1 = arith.constant 0 : i32
    return %arg0, %arg1, %c0_i32, %c0_i32_0 : i32, i32, i32, i32
  }
  func.func @transform_7(%arg0: i32, %arg1: i32) -> (i32, i32, i32, i32) {
    %c0_i32 = arith.constant 0 : i32
    %c0_i32_0 = arith.constant 0 : i32
    %c0_i32_1 = arith.constant 0 : i32
    return %arg0, %arg1, %c0_i32, %c0_i32_0 : i32, i32, i32, i32
  }
}

</mosaic_0001>

<bundles_post_ra>
// kernel: tpu_custom_call.1
= control target key start
LH: loop header
LB: loop body
LE: loop exit
PB: predicated region body
PF: predicated region fallthrough
CT: control target
= control target key end

     0   :  { %s1589_s0 = inlined_call_operand.vmem [shape: f32[2,3,128], index: 0, kind: input, shape index: {}]   ;;  %s1590_s1 = inlined_call_operand.vmem [shape: f32[2,16,3], index: 1, kind: input, shape index: {}]   ;;  %s1591_s2 = inlined_call_operand.vmem [shape: bf16[2,8,128], index: 2, kind: input, shape index: {}]   ;;  %s1592_s3 = inlined_call_operand.vmem [shape: bf16[2,32,16], index: 3, kind: input, shape index: {}]   ;;  %s1593_s4 = inlined_call_operand.vmem [shape: bf16[32,8], index: 4, kind: input, shape index: {}]   ;;  %s1594_s5 = inlined_call_operand.hbm [shape: bf16[2,32,128], index: 5, kind: output, shape index: {0}]   ;;  %s1595_s6 = inlined_call_operand.vmem [shape: f32[2,1,32,1], index: 6, kind: output, shape index: {1}]   ;;  %s1596_s7 = inlined_call_operand.vmem [shape: f32[2,1,32,1], index: 7, kind: output, shape index: {2}]  }
   0x1   :  { %1597 = sst [smem:[#allocation5_spill]] %s1589_s0 }
   0x2   :  { %13 = vsyncpa [#allocation3], 0 }
   0x3   :  { %15 = vsyncpa [#allocation3 + $0x1], 0  ;;  %s1389_s24 = smov 0   ;;  %s1391_s25 = smov 0  }
   0x4   :  { %s1393_s26 = smov 0   ;;  %s1395_s27 = smov 0  }
   0x5   :  { %s1397_s28 = smov 0   ;;  %s1399_s29 = smov 0  }
   0x6 LB: > { %s1123_s30 = sadd.s32 4294967295, %s1342_s29   ;;  %s1124_s8 = sadd.s32 4294967294, %s1342_s29   ;;  %s1342_s29 = sphi %s1399_s29, %s21_s29   ;;  %s1338_s28 = sphi %s1397_s28, %s1605_s28   ;;  %s1334_s27 = sphi %s1395_s27, %s1604_s27   ;;  %s1330_s26 = sphi %s1393_s26, %s1603_s26   ;;  %s1326_s25 = sphi %s1391_s25, %s1602_s25   ;;  %s1322_s24 = sphi %s1389_s24, %s1601_s24  }
   0x7   : > { %s33_s9 = sadd.s32 1, %s1338_s28  ;;  %s171_s10 = sadd.s32 1, %s1330_s26 }
   0x8   : > { %p35_p0 = scmp.ge.s32.totalorder %s33_s9, 2  ;;  %p181_p1 = scmp.ne.s32.totalorder %s1330_s26, %s1326_s25 }
   0x9   : > { %p182_p2 = scmp.eq.s32.totalorder %s1123_s30, 1  ;;  %p187_p3 = scmp.ne.s32.totalorder %s1326_s25, %s1322_s24 }
   0xa   : > { %s1607_s9 = smov (%p35_p0, %s33_s9), 0  ;;  %p188_p5 = scmp.eq.s32.totalorder %s1124_s8, 1 }
   0xb   : > { %p1429_p4 = por %p182_p2, %p181_p1  ;;  %s166_s12 = ssub.s32 %s1338_s28, %s1607_s9 }
   0xc   : > { %p1127_p6 = scmp.ge.s32.totalorder %s1342_s29, 1  ;;  %p169_p7 = scmp.eq.s32.totalorder %s166_s12, 0 }
   0xd   : > { %p1436_p8 = por %p188_p5, %p187_p3  ;;  %p301_p9 = scmp.lt.s32.totalorder %s1342_s29, 3 }
   0xe   : > { %s1442_s14 = scalar_select %p169_p7, %s1330_s26, %s171_s10  }
   0xf   : > { %p302_p10 = pnand %p1127_p6, %p301_p9 }
  0x10   : > { %p370_p11 = scmp.lt.s32.totalorder (!%p302_p10), %s1334_s27, 1  ;;  %s1600_s0 = sld [smem:[#allocation5_spill]] (!%p302_p10) }
  0x11   : > { %305 = sbr.rel (%p302_p10) target bundleno = 644 (0x284), region = 40  ;;  %s1172_s30 = sshll.u32 (!%p302_p10), %s1334_s27, 4 }
  0x12   : > { %s917_s12 = scalar_lea.hbm (!%p302_p10), %s1594_s5, %s1172_s30  ;;  %s1284_s30 = scalar_lea.hbm (!%p302_p10), %s1594_s5, 32 }
  0x16   : > { %v1344_v0 = vmov 1   ;;  %v1345_v1 = vmov 0   ;;  %s1446_s15 = scalar_select %p370_p11, %s1334_s27, 1  ;;  %v1346_v2 = vmov 2   ;;  %v463_v33 = vlaneseq }
  0x17   : > { %1247 = vset.pattern.permute.xlu1 %v1344_v0  ;;  %1246 = vset.pattern.permute.xlu0 %v1345_v1 }
  0x18   : > { %1248 = vset.pattern.permute.xlu2 %v1346_v2  ;;  %s1164_s16 = sshll.u32 %s1446_s15, 4  ;;  %s1129_s20 = sshll.u32 %s1446_s15, 2  ;;  %v1460_v36 = vshrl.u32 %v463_v33, 7 }
  0x19   : > { %s381_s19 = scalar_lea.vmem %s1590_s1, %s1164_s16  ;;  %s376_s23 = scalar_lea.vmem %s1600_s0, %s1129_s20 }
  0x1a   : > { %v414_v3 = vld [vmem:[%s381_s19] sm:$0xff]  ;;  %v415_v4 = vld [vmem:[%s381_s19 + $0x8] sm:$0xff]  ;;  %v1463_v39 = vadd.s32 8, %v1460_v36  ;;  %s388_s10 = scalar_lea.vmem %s1591_s2, %s1129_s20  ;;  %s393_s22 = scalar_lea.vmem %s1592_s3, %s1164_s16 }
  0x1b   : > { %434 = vperm.xlu1 %1247, %v414_v3   ;;  %418 = vperm.xlu0 %1246, %v414_v3   ;;  %v413_v6 = vld [vmem:[%s376_s23] sm:$0x7]  ;;  %s345_s23 = sand.u32 1, %s1326_s25   ;;  %s920_s19 = sshll.u32 %s917_s12, 4  ;;  %s921_s19 = int_to_ptr.hbm [resolvable:$true] %s920_s19 }
  0x1c   : > { %449 = vperm.xlu2 %1248, %v414_v3   ;;  %v441_v7 = vperm.slane %v413_v6, 1  ;;  %v426_v8 = vperm.slane %v413_v6, 0  ;;  %v456_v11 = vperm.slane %v413_v6, 2  ;;  %s1128_s16 = sshll.u32 %s345_s23, 4  ;;  %s887_s27 = scalar_lea.sflag [#allocation3], %s345_s23 }
  0x1d   : > { %s347_s17 = scalar_lea.vmem [#allocation2], %s1128_s16  ;;  %s1278_s20 = sshra.s32 %s921_s19, 4  ;;  %s1279_s20 = int_to_ptr.hbm [resolvable:$true] %s1278_s20 }
  0x1e   : > { %s918_s18 = sshll.u32 %s347_s17, 4  ;;  %s1280_s21 = scalar_lea.hbm %s1279_s20, 16  ;;  %s919_s18 = int_to_ptr.vmem [resolvable:$true] %s918_s18 }
  0x1f   : > { %p1281_p12 = scmp.ne.s32.totalorder %s1279_s20, %s1280_s21  ;;  %p1285_p1 = scmp.lt.s32.totalorder %s1279_s20, %s1594_s5 }
  0x20   : > { %p1286_p2 = scmp.lt.s32.totalorder %s1284_s30, %s1280_s21 }
  0x21   : > { %p1282_p13 = pnand %p1281_p12, %p1429_p4 }
  0x22   : > { %p1287_p3 = por %p1286_p2, %p1285_p1 }
  0x23   : > { %438 = vperm.xlu1 %1247, %v415_v4   ;;  %423 = vperm.xlu0 %1246, %v415_v4   ;;  %p1283_p0 = pneg %p1282_p13 }
  0x24   : > { %453 = vperm.xlu2 %1248, %v415_v4  }
  0x25   : > { %p1288_p5 = pnand %p1287_p3, %p1283_p0 }
  0x2b   : > { %1249 = vset.pattern.permute.xlu0 %v1346_v2 }
  0x76   : > { %v450_v5 = vpop.permute.xlu2 %449 }
  0x77   : > { %v457_v15 = vsub.f32 %v450_v5, %v456_v11 }
  0x79   : > { %v459_v23 = vmul.f32 %v457_v15, %v457_v15 }
  0x7e   : > { %v454_v14 = vpop.permute.xlu2 %453 }
  0x7f   : > { %v458_v20 = vsub.f32 %v454_v14, %v456_v11 }
  0x81   : > { %v460_v27 = vmul.f32 %v458_v20, %v458_v20 }
  0x8d   : > { %v435_v9 = vpop.permute.xlu1 %434  ;;  %v419_v10 = vpop.permute.xlu0 %418 }
  0x8e   : > { %v442_v12 = vsub.f32 %v435_v9, %v441_v7  ;;  %v427_v13 = vsub.f32 %v419_v10, %v426_v8 }
  0x90   : > { %v444_v16 = vmul.f32 %v442_v12, %v442_v12  ;;  %v429_v17 = vmul.f32 %v427_v13, %v427_v13  ;;  %v767_v13 = vld [vmem:[%s388_s10] sm:$0xf] }
  0x92   : > { %v446_v24 = vadd.f32 %v444_v16, %v429_v17  ;;  %v1169_v16 = vld [vmem:[%s1593_s4 + $0x8] sm:$0xff] }
  0x94   : > { %v461_v29 = vadd.f32 %v459_v23, %v446_v24 }
  0x95   : > { %v439_v18 = vpop.permute.xlu1 %438  ;;  %v424_v19 = vpop.permute.xlu0 %423 }
  0x96   : > { %v443_v21 = vsub.f32 %v439_v18, %v441_v7  ;;  %v428_v22 = vsub.f32 %v424_v19, %v426_v8 }
  0x98   : > { %v445_v25 = vmul.f32 %v443_v21, %v443_v21  ;;  %v430_v26 = vmul.f32 %v428_v22, %v428_v22 }
  0x9a   : > { %v447_v28 = vadd.f32 %v445_v25, %v430_v26 }
  0x9c   : > { %v462_v30 = vadd.f32 %v460_v27, %v447_v28 }
  0x9e   : > { %v466_v31 = vmin.f32 %v461_v29, %v462_v30 }
  0xa0   : > { %v467_v32 = vrot.slane %v466_v31, 4 }
  0xa2   : > { %v468_v34 = vmin.f32 %v466_v31, %v467_v32 }
  0xa4   : > { %v469_v35 = vrot.slane %v468_v34, 2 }
  0xa6   : > { %v470_v37 = vmin.f32 %v468_v34, %v469_v35 }
  0xa8   : > { %v471_v38 = vrot.slane %v470_v37, 1 }
  0xaa   : > { %v472_v40 = vmin.f32 %v470_v37, %v471_v38 }
  0xac   : > { %vm473_vm0 = vcmp.eq.f32.partialorder %v461_v29, %v472_v40  ;;  %vm474_vm1 = vcmp.eq.f32.partialorder %v462_v30, %v472_v40  ;;  %v490_v41 = vadd.f32 1e-08, %v472_v40 }
  0xad   : > { %v475_v42 = vsel %vm473_vm0, %v1460_v36, 16  ;;  %v476_v43 = vsel %vm474_vm1, %v1463_v39, 16  ;;  %vm826_vm0 = vcmask 1043456   ;;  %vm819_vm1 = vcmask 64512  }
  0xae   : > { %vm477_vm2 = vcmp.lt.s32.totalorder %v475_v42, %v476_v43  ;;  %1250 = vrcp.f32 %v490_v41  ;;  %v502_v53 = vand.u32 2147483648, %v490_v41  ;;  %v500_v55 = vand.u32 2147483647, %v490_v41 }
  0xaf   : > { %v478_v44 = vsel %vm477_vm2, %v475_v42, %v476_v43  ;;  %vm496_vm7 = vweird.f32 %v490_v41  ;;  %v828_v15 = vsel %vm826_vm0, %v767_v13, 0 }
  0xb0   : > { %v479_v45 = vrot.slane %v478_v44, 4  ;;  %v503_v58 = vor.u32 1.1754944e-38, %v502_v53  ;;  %vm501_vm11 = vcmp.eq.f32.partialorder %v500_v55, 8.507059e+37  ;;  %1185 = vmatpush.bf16.msra.mxu3 %v828_v15  ;;  %837 = vmatpush.bf16.msra.mxu1 %v828_v15 }
  0xb2   : > { %vm480_vm3 = vcmp.lt.s32.totalorder %v478_v44, %v479_v45 }
  0xb3   : > { %v481_v46 = vsel %vm480_vm3, %v478_v44, %v479_v45  ;;  %1158 = vmatmul.msk.bf16.vlgmr.msra.gmra.mxu3 %vm819_vm1, %v1169_v16 }
  0xb4   : > { %v1251_v47 = vpop.eup %1250  ;;  %v482_v48 = vrot.slane %v481_v46, 2 }
  0xb5   : > { %v492_v49 = vmul.f32 %v1251_v47, %v490_v41  ;;  %vm497_vm5 = vweird.f32 %v1251_v47 }
  0xb6   : > { %vm483_vm4 = vcmp.lt.s32.totalorder %v481_v46, %v482_v48  ;;  %vm498_vm10 = vmor %vm496_vm7, %vm497_vm5 }
  0xb7   : > { %v484_v50 = vsel %vm483_vm4, %v481_v46, %v482_v48  ;;  %v493_v51 = vsub.f32 1.0, %v492_v49 }
  0xb8   : > { %v485_v52 = vrot.slane %v484_v50, 1 }
  0xb9   : > { %v494_v54 = vmul.f32 %v1251_v47, %v493_v51 }
  0xba   : > { %vm486_vm6 = vcmp.lt.s32.totalorder %v484_v50, %v485_v52 }
  0xbb   : > { %v487_v56 = vsel %vm486_vm6, %v484_v50, %v485_v52  ;;  %v495_v57 = vadd.f32 %v1251_v47, %v494_v54 }
  0xbc   : > { %vm488_vm8 = vcmp.eq.s32.totalorder %v1460_v36, %v487_v56  ;;  %vm489_vm9 = vcmp.eq.s32.totalorder %v1463_v39, %v487_v56 }
  0xbd   : > { %v499_v59 = vsel %vm498_vm10, %v1251_v47, %v495_v57  ;;  %v511_v60 = vsel %vm488_vm8, 1e+30, %v461_v29  ;;  %v512_v61 = vsel %vm489_vm9, 1e+30, %v462_v30 }
  0xbe   : > { %v504_v62 = vsel %vm501_vm11, %v503_v58, %v499_v59  ;;  %v513_v63 = vmin.f32 %v511_v60, %v512_v61 }
  0xbf   : > { %v506_v0 = vsel %vm488_vm8, %v504_v62, 0.0  ;;  %v507_v1 = vsel %vm489_vm9, %v504_v62, 0.0 }
  0xc0   : > { %v514_v2 = vrot.slane %v513_v63, 4 }
  0xc2   : > { %v515_v3 = vmin.f32 %v513_v63, %v514_v2 }
  0xc4   : > { %v516_v4 = vrot.slane %v515_v3, 2 }
  0xc6   : > { %v517_v5 = vmin.f32 %v515_v3, %v516_v4 }
  0xc8   : > { %v518_v6 = vrot.slane %v517_v5, 1 }
  0xca   : > { %v519_v7 = vmin.f32 %v517_v5, %v518_v6 }
  0xcc   : > { %vm520_vm12 = vcmp.eq.f32.partialorder %v511_v60, %v519_v7  ;;  %vm521_vm13 = vcmp.eq.f32.partialorder %v512_v61, %v519_v7  ;;  %v537_v8 = vadd.f32 1e-08, %v519_v7 }
  0xcd   : > { %v522_v9 = vsel %vm520_vm12, %v1460_v36, 16  ;;  %v523_v10 = vsel %vm521_vm13, %v1463_v39, 16 }
  0xce   : > { %vm524_vm14 = vcmp.lt.s32.totalorder %v522_v9, %v523_v10  ;;  %1252 = vrcp.f32 %v537_v8  ;;  %v549_v23 = vand.u32 2147483648, %v537_v8  ;;  %v547_v25 = vand.u32 2147483647, %v537_v8 }
  0xcf   : > { %v525_v11 = vsel %vm524_vm14, %v522_v9, %v523_v10  ;;  %vm543_vm5 = vweird.f32 %v537_v8 }
  0xd0   : > { %v526_v12 = vrot.slane %v525_v11, 4  ;;  %v550_v28 = vor.u32 1.1754944e-38, %v549_v23  ;;  %vm548_vm9 = vcmp.eq.f32.partialorder %v547_v25, 8.507059e+37 }
  0xd2   : > { %vm527_vm15 = vcmp.lt.s32.totalorder %v525_v11, %v526_v12 }
  0xd3   : > { %v528_v14 = vsel %vm527_vm15, %v525_v11, %v526_v12 }
  0xd4   : > { %v1253_v17 = vpop.eup %1252  ;;  %v529_v18 = vrot.slane %v528_v14, 2 }
  0xd5   : > { %v539_v19 = vmul.f32 %v1253_v17, %v537_v8  ;;  %vm544_vm3 = vweird.f32 %v1253_v17 }
  0xd6   : > { %vm530_vm2 = vcmp.lt.s32.totalorder %v528_v14, %v529_v18  ;;  %vm545_vm8 = vmor %vm543_vm5, %vm544_vm3 }
  0xd7   : > { %v531_v20 = vsel %vm530_vm2, %v528_v14, %v529_v18  ;;  %v540_v21 = vsub.f32 1.0, %v539_v19 }
  0xd8   : > { %v532_v22 = vrot.slane %v531_v20, 1 }
  0xd9   : > { %v541_v24 = vmul.f32 %v1253_v17, %v540_v21 }
  0xda   : > { %vm533_vm4 = vcmp.lt.s32.totalorder %v531_v20, %v532_v22 }
  0xdb   : > { %v534_v26 = vsel %vm533_vm4, %v531_v20, %v532_v22  ;;  %v542_v27 = vadd.f32 %v1253_v17, %v541_v24 }
  0xdc   : > { %vm535_vm6 = vcmp.eq.s32.totalorder %v1460_v36, %v534_v26  ;;  %vm536_vm7 = vcmp.eq.s32.totalorder %v1463_v39, %v534_v26 }
  0xdd   : > { %v546_v29 = vsel %vm545_vm8, %v1253_v17, %v542_v27  ;;  %v558_v30 = vsel %vm535_vm6, 1e+30, %v511_v60  ;;  %v559_v31 = vsel %vm536_vm7, 1e+30, %v512_v61 }
  0xde   : > { %v551_v32 = vsel %vm548_vm9, %v550_v28, %v546_v29  ;;  %v560_v33 = vmin.f32 %v558_v30, %v559_v31 }
  0xdf   : > { %v554_v34 = vsel %vm536_vm7, %v551_v32, 0.0  ;;  %v557_v35 = vadd.f32 %v551_v32, %v504_v62  ;;  %v553_v37 = vsel %vm535_vm6, %v551_v32, 0.0 }
  0xe0   : > { %v556_v38 = vadd.f32 %v554_v34, %v507_v1  ;;  %v561_v40 = vrot.slane %v560_v33, 4  ;;  %v555_v41 = vadd.f32 %v553_v37, %v506_v0 }
  0xe2   : > { %v562_v42 = vmin.f32 %v560_v33, %v561_v40 }
  0xe4   : > { %v563_v43 = vrot.slane %v562_v42, 2 }
  0xe6   : > { %v564_v44 = vmin.f32 %v562_v42, %v563_v43 }
  0xe8   : > { %v565_v45 = vrot.slane %v564_v44, 1 }
  0xea   : > { %v566_v46 = vmin.f32 %v564_v44, %v565_v45 }
  0xec   : > { %vm567_vm10 = vcmp.eq.f32.partialorder %v558_v30, %v566_v46  ;;  %vm568_vm11 = vcmp.eq.f32.partialorder %v559_v31, %v566_v46  ;;  %v584_v47 = vadd.f32 1e-08, %v566_v46 }
  0xed   : > { %v569_v48 = vsel %vm567_vm10, %v1460_v36, 16  ;;  %v570_v49 = vsel %vm568_vm11, %v1463_v39, 16 }
  0xee   : > { %vm571_vm12 = vcmp.lt.s32.totalorder %v569_v48, %v570_v49  ;;  %1254 = vrcp.f32 %v584_v47  ;;  %v596_v59 = vand.u32 2147483648, %v584_v47  ;;  %v594_v61 = vand.u32 2147483647, %v584_v47 }
  0xef   : > { %v572_v50 = vsel %vm571_vm12, %v569_v48, %v570_v49  ;;  %vm590_vm2 = vweird.f32 %v584_v47 }
  0xf0   : > { %v573_v51 = vrot.slane %v572_v50, 4  ;;  %v597_v0 = vor.u32 1.1754944e-38, %v596_v59  ;;  %vm595_vm6 = vcmp.eq.f32.partialorder %v594_v61, 8.507059e+37 }
  0xf2   : > { %vm574_vm13 = vcmp.lt.s32.totalorder %v572_v50, %v573_v51 }
  0xf3   : > { %v575_v52 = vsel %vm574_vm13, %v572_v50, %v573_v51 }
  0xf4   : > { %v1255_v53 = vpop.eup %1254  ;;  %v576_v54 = vrot.slane %v575_v52, 2 }
  0xf5   : > { %v586_v55 = vmul.f32 %v1255_v53, %v584_v47  ;;  %vm591_vm15 = vweird.f32 %v1255_v53 }
  0xf6   : > { %vm577_vm14 = vcmp.lt.s32.totalorder %v575_v52, %v576_v54  ;;  %vm592_vm5 = vmor %vm590_vm2, %vm591_vm15 }
  0xf7   : > { %v578_v56 = vsel %vm577_vm14, %v575_v52, %v576_v54  ;;  %v587_v57 = vsub.f32 1.0, %v586_v55 }
  0xf8   : > { %v579_v58 = vrot.slane %v578_v56, 1 }
  0xf9   : > { %v588_v60 = vmul.f32 %v1255_v53, %v587_v57 }
  0xfa   : > { %vm580_vm0 = vcmp.lt.s32.totalorder %v578_v56, %v579_v58 }
  0xfb   : > { %v581_v62 = vsel %vm580_vm0, %v578_v56, %v579_v58  ;;  %v589_v63 = vadd.f32 %v1255_v53, %v588_v60 }
  0xfc   : > { %vm582_vm3 = vcmp.eq.s32.totalorder %v1460_v36, %v581_v62  ;;  %vm583_vm4 = vcmp.eq.s32.totalorder %v1463_v39, %v581_v62 }
  0xfd   : > { %v593_v1 = vsel %vm592_vm5, %v1255_v53, %v589_v63  ;;  %v605_v2 = vsel %vm582_vm3, 1e+30, %v558_v30  ;;  %v606_v3 = vsel %vm583_vm4, 1e+30, %v559_v31 }
  0xfe   : > { %v598_v4 = vsel %vm595_vm6, %v597_v0, %v593_v1  ;;  %v607_v5 = vmin.f32 %v605_v2, %v606_v3 }
  0xff   : > { %v600_v6 = vsel %vm582_vm3, %v598_v4, 0.0  ;;  %v601_v7 = vsel %vm583_vm4, %v598_v4, 0.0  ;;  %v1486_v8 = vadd.f32 %v598_v4, %v557_v35 }
 0x100   : > { %v602_v9 = vadd.f32 %v600_v6, %v555_v41  ;;  %v603_v10 = vadd.f32 %v601_v7, %v556_v38  ;;  %v608_v11 = vrot.slane %v607_v5, 4 }
 0x102   : > { %v609_v12 = vmin.f32 %v607_v5, %v608_v11 }
 0x104   : > { %v610_v13 = vrot.slane %v609_v12, 2 }
 0x106   : > { %v611_v14 = vmin.f32 %v609_v12, %v610_v13 }
 0x108   : > { %v612_v15 = vrot.slane %v611_v14, 1 }
 0x10a   : > { %v613_v16 = vmin.f32 %v611_v14, %v612_v15 }
 0x10c   : > { %vm614_vm7 = vcmp.eq.f32.partialorder %v605_v2, %v613_v16  ;;  %vm615_vm8 = vcmp.eq.f32.partialorder %v606_v3, %v613_v16  ;;  %v631_v17 = vadd.f32 1e-08, %v613_v16 }
 0x10d   : > { %v616_v18 = vsel %vm614_vm7, %v1460_v36, 16  ;;  %v617_v19 = vsel %vm615_vm8, %v1463_v39, 16 }
 0x10e   : > { %vm618_vm9 = vcmp.lt.s32.totalorder %v616_v18, %v617_v19  ;;  %1256 = vrcp.f32 %v631_v17  ;;  %v643_v29 = vand.u32 2147483648, %v631_v17  ;;  %v641_v31 = vand.u32 2147483647, %v631_v17 }
 0x10f   : > { %v619_v20 = vsel %vm618_vm9, %v616_v18, %v617_v19  ;;  %vm637_vm14 = vweird.f32 %v631_v17 }
 0x110   : > { %v620_v21 = vrot.slane %v619_v20, 4  ;;  %v644_v34 = vor.u32 1.1754944e-38, %v643_v29  ;;  %vm642_vm3 = vcmp.eq.f32.partialorder %v641_v31, 8.507059e+37 }
 0x112   : > { %vm621_vm10 = vcmp.lt.s32.totalorder %v619_v20, %v620_v21 }
 0x113   : > { %v622_v22 = vsel %vm621_vm10, %v619_v20, %v620_v21 }
 0x114   : > { %v1257_v23 = vpop.eup %1256  ;;  %v623_v24 = vrot.slane %v622_v22, 2 }
 0x115   : > { %v633_v25 = vmul.f32 %v1257_v23, %v631_v17  ;;  %vm638_vm12 = vweird.f32 %v1257_v23 }
 0x116   : > { %vm624_vm11 = vcmp.lt.s32.totalorder %v622_v22, %v623_v24  ;;  %vm639_vm2 = vmor %vm637_vm14, %vm638_vm12 }
 0x117   : > { %v625_v26 = vsel %vm624_vm11, %v622_v22, %v623_v24  ;;  %v634_v27 = vsub.f32 1.0, %v633_v25 }
 0x118   : > { %v626_v28 = vrot.slane %v625_v26, 1 }
 0x119   : > { %v635_v30 = vmul.f32 %v1257_v23, %v634_v27 }
 0x11a   : > { %vm627_vm13 = vcmp.lt.s32.totalorder %v625_v26, %v626_v28 }
 0x11b   : > { %v628_v32 = vsel %vm627_vm13, %v625_v26, %v626_v28  ;;  %v636_v33 = vadd.f32 %v1257_v23, %v635_v30 }
 0x11c   : > { %vm629_vm15 = vcmp.eq.s32.totalorder %v1460_v36, %v628_v32  ;;  %vm630_vm0 = vcmp.eq.s32.totalorder %v1463_v39, %v628_v32 }
 0x11d   : > { %v640_v35 = vsel %vm639_vm2, %v1257_v23, %v636_v33  ;;  %v652_v37 = vsel %vm629_vm15, 1e+30, %v605_v2  ;;  %v653_v38 = vsel %vm630_vm0, 1e+30, %v606_v3  ;;  %v1168_v23 = vld [vmem:[%s1593_s4] sm:$0xff] }
 0x11e   : > { %v1492_v40 = vsel %vm642_vm3, %v644_v34, %v640_v35  ;;  %v654_v41 = vmin.f32 %v652_v37, %v653_v38  ;;  %1157 = vmatmul.msk.bf16.vlgmr.msra.gmra.mxu1 %vm819_vm1, %v1168_v23 }
 0x11f   : > { %v647_v42 = vsel %vm629_vm15, %v1492_v40, 0.0  ;;  %v648_v43 = vsel %vm630_vm0, %v1492_v40, 0.0  ;;  %v651_v32 = vadd.f32 %v1492_v40, %v1486_v8 }
 0x120   : > { %v1496_v44 = vadd.f32 %v647_v42, %v602_v9  ;;  %v1498_v45 = vadd.f32 %v648_v43, %v603_v10  ;;  %v655_v46 = vrot.slane %v654_v41, 4 }
 0x122   : > { %v656_v47 = vmin.f32 %v654_v41, %v655_v46 }
 0x124   : > { %v657_v48 = vrot.slane %v656_v47, 2 }
 0x126   : > { %v658_v49 = vmin.f32 %v656_v47, %v657_v48 }
 0x128   : > { %v659_v50 = vrot.slane %v658_v49, 1 }
 0x12a   : > { %v660_v51 = vmin.f32 %v658_v49, %v659_v50 }
 0x12c   : > { %vm661_vm4 = vcmp.eq.f32.partialorder %v652_v37, %v660_v51  ;;  %vm662_vm5 = vcmp.eq.f32.partialorder %v653_v38, %v660_v51  ;;  %v678_v60 = vadd.f32 1e-08, %v660_v51 }
 0x12d   : > { %v663_v52 = vsel %vm661_vm4, %v1460_v36, 16  ;;  %v664_v53 = vsel %vm662_vm5, %v1463_v39, 16 }
 0x12e   : > { %vm665_vm6 = vcmp.lt.s32.totalorder %v663_v52, %v664_v53  ;;  %1258 = vrcp.f32 %v678_v60  ;;  %v690_v19 = vand.u32 2147483648, %v678_v60  ;;  %vm684_vm2 = vweird.f32 %v678_v60 }
 0x12f   : > { %v666_v54 = vsel %vm665_vm6, %v663_v52, %v664_v53  ;;  %v688_v21 = vand.u32 2147483647, %v678_v60 }
 0x130   : > { %v667_v55 = vrot.slane %v666_v54, 4  ;;  %v691_v27 = vor.u32 1.1754944e-38, %v690_v19 }
 0x131   : > { %vm689_vm4 = vcmp.eq.f32.partialorder %v688_v21, 8.507059e+37 }
 0x132   : > { %vm668_vm7 = vcmp.lt.s32.totalorder %v666_v54, %v667_v55 }
 0x133   : > { %v669_v56 = vsel %vm668_vm7, %v666_v54, %v667_v55 }
 0x134   : > { %v670_v57 = vrot.slane %v669_v56, 2  ;;  %v1259_v3 = vpop.eup %1258 }
 0x135   : > { %v680_v6 = vmul.f32 %v1259_v3, %v678_v60  ;;  %vm685_vm0 = vweird.f32 %v1259_v3 }
 0x136   : > { %vm671_vm8 = vcmp.lt.s32.totalorder %v669_v56, %v670_v57  ;;  %vm686_vm3 = vmor %vm684_vm2, %vm685_vm0  ;;  %vm783_vm0 = vcmask 130048  }
 0x137   : > { %v672_v58 = vsel %vm671_vm8, %v669_v56, %v670_v57  ;;  %v681_v10 = vsub.f32 1.0, %v680_v6 }
 0x138   : > { %v673_v59 = vrot.slane %v672_v58, 1 }
 0x139   : > { %v682_v14 = vmul.f32 %v1259_v3, %v681_v10 }
 0x13a   : > { %vm674_vm9 = vcmp.lt.s32.totalorder %v672_v58, %v673_v59 }
 0x13b   : > { %v1502_v61 = vsel %vm674_vm9, %v672_v58, %v673_v59  ;;  %v683_v17 = vadd.f32 %v1259_v3, %v682_v14 }
 0x13c   : > { %vm676_vm10 = vcmp.eq.s32.totalorder %v1460_v36, %v1502_v61  ;;  %vm677_vm11 = vcmp.eq.s32.totalorder %v1463_v39, %v1502_v61 }
 0x13d   : > { %v699_v62 = vsel %vm676_vm10, 1e+30, %v652_v37  ;;  %v700_v63 = vsel %vm677_vm11, 1e+30, %v653_v38  ;;  %v687_v24 = vsel %vm686_vm3, %v1259_v3, %v683_v17  ;;  %v844_v3 = vpop.f32.mrf.mxu3 }
 0x13e   : > { %v701_v0 = vmin.f32 %v699_v62, %v700_v63  ;;  %v692_v31 = vsel %vm689_vm4, %v691_v27, %v687_v24 }
 0x13f   : > { %v698_v35 = vadd.f32 %v692_v31, %v651_v32  ;;  %v694_v8 = vsel %vm676_vm10, %v692_v31, 0.0  ;;  %v695_v40 = vsel %vm677_vm11, %v692_v31, 0.0 }
 0x140   : > { %v702_v1 = vrot.slane %v701_v0, 4  ;;  %v696_v55 = vadd.f32 %v694_v8, %v1496_v44  ;;  %v697_v56 = vadd.f32 %v695_v40, %v1498_v45  ;;  %v1171_v45 = vld [vmem:[%s393_s22 + $0x8] sm:$0xff] }
 0x142   : > { %v703_v2 = vmin.f32 %v701_v0, %v702_v1 }
 0x144   : > { %v704_v4 = vrot.slane %v703_v2, 2 }
 0x146   : > { %v705_v5 = vmin.f32 %v703_v2, %v704_v4 }
 0x148   : > { %v706_v7 = vrot.slane %v705_v5, 1 }
 0x14a   : > { %v707_v9 = vmin.f32 %v705_v5, %v706_v7 }
 0x14c   : > { %vm708_vm12 = vcmp.eq.f32.partialorder %v699_v62, %v707_v9  ;;  %vm709_vm13 = vcmp.eq.f32.partialorder %v700_v63, %v707_v9  ;;  %v725_v11 = vadd.f32 1e-08, %v707_v9  ;;  %v1170_v63 = vld [vmem:[%s393_s22] sm:$0xff] }
 0x14d   : > { %v710_v12 = vsel %vm708_vm12, %v1460_v36, 16  ;;  %v711_v13 = vsel %vm709_vm13, %v1463_v39, 16 }
 0x14e   : > { %vm712_vm14 = vcmp.lt.s32.totalorder %v710_v12, %v711_v13  ;;  %1260 = vrcp.f32 %v725_v11  ;;  %v737_v28 = vand.u32 2147483648, %v725_v11  ;;  %v735_v30 = vand.u32 2147483647, %v725_v11 }
 0x14f   : > { %v713_v15 = vsel %vm712_vm14, %v710_v12, %v711_v13  ;;  %vm731_vm7 = vweird.f32 %v725_v11  ;;  %v846_v12 = vpop.f32.mrf.mxu3 }
 0x150   : > { %v714_v16 = vrot.slane %v713_v15, 4  ;;  %v738_v34 = vor.u32 1.1754944e-38, %v737_v28  ;;  %vm736_vm9 = vcmp.eq.f32.partialorder %v735_v30, 8.507059e+37 }
 0x152   : > { %vm715_vm15 = vcmp.lt.s32.totalorder %v713_v15, %v714_v16 }
 0x153   : > { %v716_v20 = vsel %vm715_vm15, %v713_v15, %v714_v16 }
 0x154   : > { %v1261_v18 = vpop.eup %1260  ;;  %v717_v25 = vrot.slane %v716_v20, 2 }
 0x155   : > { %v727_v22 = vmul.f32 %v1261_v18, %v725_v11  ;;  %vm732_vm5 = vweird.f32 %v1261_v18 }
 0x156   : > { %vm718_vm6 = vcmp.lt.s32.totalorder %v716_v20, %v717_v25  ;;  %vm733_vm8 = vmor %vm731_vm7, %vm732_vm5 }
 0x157   : > { %v728_v26 = vsub.f32 1.0, %v727_v22  ;;  %v719_v38 = vsel %vm718_vm6, %v716_v20, %v717_v25 }
 0x158   : > { %v720_v43 = vrot.slane %v719_v38, 1 }
 0x159   : > { %v729_v29 = vmul.f32 %v1261_v18, %v728_v26 }
 0x15a   : > { %vm721_vm1 = vcmp.lt.s32.totalorder %v719_v38, %v720_v43 }
 0x15b   : > { %v730_v33 = vadd.f32 %v1261_v18, %v729_v29  ;;  %v722_v47 = vsel %vm721_vm1, %v719_v38, %v720_v43 }
 0x15c   : > { %vm723_vm12 = vcmp.eq.s32.totalorder %v1460_v36, %v722_v47  ;;  %vm724_vm13 = vcmp.eq.s32.totalorder %v1463_v39, %v722_v47 }
 0x15d   : > { %v734_v37 = vsel %vm733_vm8, %v1261_v18, %v730_v33 }
 0x15e   : > { %v739_v41 = vsel %vm736_vm9, %v738_v34, %v734_v37 }
 0x15f   : > { %v745_v42 = vadd.f32 %v739_v41, %v698_v35  ;;  %v741_v53 = vsel %vm723_vm12, %v739_v41, 0.0  ;;  %v742_v54 = vsel %vm724_vm13, %v739_v41, 0.0 }
 0x160   : > { %v743_v59 = vadd.f32 %v741_v53, %v696_v55  ;;  %v744_v60 = vadd.f32 %v742_v54, %v697_v56 }
 0x161   : > { %1262 = vrcp.f32 %v745_v42  ;;  %v757_v50 = vand.u32 2147483648, %v745_v42  ;;  %v755_v52 = vand.u32 2147483647, %v745_v42  ;;  %vm751_vm10 = vweird.f32 %v745_v42 }
 0x163   : > { %v758_v58 = vor.u32 1.1754944e-38, %v757_v50  ;;  %vm756_vm11 = vcmp.eq.f32.partialorder %v755_v52, 8.507059e+37 }
 0x167   : > { %v1263_v46 = vpop.eup %1262 }
 0x168   : > { %v747_v48 = vmul.f32 %v1263_v46, %v745_v42  ;;  %vm752_vm14 = vweird.f32 %v1263_v46 }
 0x169   : > { %vm753_vm15 = vmor %vm751_vm10, %vm752_vm14 }
 0x16a   : > { %v748_v49 = vsub.f32 1.0, %v747_v48 }
 0x16c   : > { %v749_v51 = vmul.f32 %v1263_v46, %v748_v49 }
 0x16e   : > { %v750_v57 = vadd.f32 %v1263_v46, %v749_v51 }
 0x170   : > { %v754_v36 = vsel %vm753_vm15, %v1263_v46, %v750_v57 }
 0x171   : > { %v759_v61 = vsel %vm756_vm11, %v758_v58, %v754_v36 }
 0x172   : > { %v761_v39 = vmul.f32 %v759_v61, %v743_v59  ;;  %v762_v62 = vmul.f32 %v759_v61, %v744_v60 }
 0x174   : > { %v772_v44 = vpack.c.bf16 %v762_v62, %v761_v39 }
 0x176   : > { %797 = vmatpush.bf16.msra.mxu0 %v772_v44  ;;  %1184 = vmatpush.bf16.msra.mxu2 %v772_v44 }
 0x179   : > { %1147 = vmatmul.msk.bf16.vlgmr.msra.gmra.mxu0 %vm783_vm0, %v1170_v63  ;;  %1148 = vmatmul.msk.bf16.vlgmr.msra.gmra.mxu2 %vm783_vm0, %v1171_v45 }
 0x19b   : > { %v839_v0 = vpop.f32.mrf.mxu1 }
 0x1a3   : > { %v841_v7 = vpop.f32.mrf.mxu1 }
 0x1f6   : > { %v799_v1 = vpop.f32.mrf.mxu0 }
 0x1f7   : > { %v840_v2 = vadd.f32 %v839_v0, %v799_v1 }
 0x1f9   : > { %857 = vadd.xlane.f32.xlu0 %v840_v2  ;;  %v870_v6 = vmul.f32 %v840_v2, %v840_v2 }
 0x1fc   : > { %v804_v4 = vpop.f32.mrf.mxu2 }
 0x1fd   : > { %v845_v5 = vadd.f32 %v844_v3, %v804_v4 }
 0x1fe   : > { %v801_v9 = vpop.f32.mrf.mxu0 }
 0x1ff   : > { %v842_v10 = vadd.f32 %v841_v7, %v801_v9  ;;  %861 = vadd.xlane.f32.xlu2 %v845_v5 }
 0x201   : > { %v1176_v11 = vpack.c.bf16 %v842_v10, %v840_v2  ;;  %874 = vadd.xlane.f32.xlu0 %v870_v6  ;;  %859 = vadd.xlane.f32.xlu1 %v842_v10  ;;  %v871_v17 = vmul.f32 %v842_v10, %v842_v10 }
 0x203   : > { %1177 = vst [vmem:[%s347_s17] sm:$0xff] %v1176_v11  }
 0x204   : > { %v806_v13 = vpop.f32.mrf.mxu2 }
 0x205   : > { %v847_v14 = vadd.f32 %v846_v12, %v806_v13 }
 0x207   : > { %v1181_v15 = vpack.c.bf16 %v847_v14, %v845_v5  ;;  %863 = vadd.xlane.f32.xlu2 %v847_v14  ;;  %v873_v16 = vmul.f32 %v847_v14, %v847_v14 }
 0x209   : > { %1183 = vst [vmem:[%s347_s17 + $0x8] sm:$0xff] %v1181_v15   ;;  %880 = vadd.xlane.f32.xlu0 %v873_v16  ;;  %876 = vadd.xlane.f32.xlu1 %v871_v17 }
 0x20a   : > { %1291 = shalt.err (!%p1288_p5)
}
 0x20b   : > { %s1347_s23 = smov 64   ;;  %s1348_s12 = smov 4   ;;  %v872_v18 = vmul.f32 %v845_v5, %v845_v5  ;;  %vm865_vm2 = vcmask 7168  }
 0x20c   : > { %1186 = dma.vmem_to_hbm [thread:$0]  (%p1429_p4), %s919_s18, 256, %s921_s19, %s887_s27, %s1347_s23, %s1347_s23, %s1348_s12  }
 0x20d   : > { %s1166_s17 = sshll.u32 %s1446_s15, 5 }
 0x20e   : > { %s402_s16 = scalar_lea.vmem %s1595_s6, %s1166_s17  ;;  %s411_s30 = scalar_lea.vmem %s1596_s7, %s1166_s17 }
 0x20f   : > { %878 = vadd.xlane.f32.xlu2 %v872_v18 }
 0x26c   : > { %v858_v19 = vpop.xlane.xlu0 %857 }
 0x26d   : > { %866 = vst.msk [vmem:[%s402_s16] sm:$0xff] %vm865_vm2, %v858_v19 }
 0x272   : > { %v862_v20 = vpop.xlane.xlu2 %861 }
 0x273   : > { %868 = vst.msk [vmem:[%s402_s16 + $0x10] sm:$0xff] %vm865_vm2, %v862_v20 }
 0x274   : > { %v875_v21 = vpop.xlane.xlu0 %874  ;;  %v860_v22 = vpop.xlane.xlu1 %859 }
 0x275   : > { %882 = vst.msk [vmem:[%s411_s30] sm:$0xff] %vm865_vm2, %v875_v21 }
 0x276   : > { %867 = vst.msk [vmem:[%s402_s16 + $0x8] sm:$0xff] %vm865_vm2, %v860_v22 }
 0x27a   : > { %v864_v23 = vpop.xlane.xlu2 %863 }
 0x27b   : > { %869 = vst.msk [vmem:[%s402_s16 + $0x18] sm:$0xff] %vm865_vm2, %v864_v23 }
 0x27c   : > { %v881_v24 = vpop.xlane.xlu0 %880  ;;  %v877_v25 = vpop.xlane.xlu1 %876 }
 0x27d   : > { %885 = vst.msk [vmem:[%s411_s30 + $0x18] sm:$0xff] %vm865_vm2, %v881_v24 }
 0x27e   : > { %883 = vst.msk [vmem:[%s411_s30 + $0x8] sm:$0xff] %vm865_vm2, %v877_v25 }
 0x282   : > { %v879_v26 = vpop.xlane.xlu2 %878 }
 0x283   : > { %884 = vst.msk [vmem:[%s411_s30 + $0x10] sm:$0xff] %vm865_vm2, %v879_v26 }
 0x284 PF: > { %p1192_p4 = scmp.ge.s32.totalorder %s1342_s29, 2  ;;  %s941_s0 = sand.u32 1, %s1322_s24  }
 0x285   : > { %s942_s11 = scalar_lea.sflag [#allocation3], %s941_s0 }
 0x286   : > { %p1189_p6 = pnand %p1192_p4, %p1436_p8 }
 0x288   : > { %p1190_p7 = pneg %p1189_p6 }
 0x28a   : > { %1317 = dma.done.wait (%p1190_p7), %s942_s11, 256  }
 0x28b   : > { %1319 = vsyncadd (%p1190_p7), %s942_s11, 4294967040  ;;  %s21_s29 = sadd.s32 1, %s1342_s29   ;;  %s1601_s24 = smov %s1326_s25 }
 0x28c   : > { %p18_p9 = scmp.ge.s32.totalorder %s21_s29, 4   ;;  %s1602_s25 = smov %s1330_s26 }
 0x28d   : > { %s1603_s26 = smov %s1442_s14  ;;  %s1604_s27 = smov %s1338_s28 }
 0x28e   : > { %s1605_s28 = smov %s1607_s9  ;;  %20 = sbr.rel (!%p18_p9) target bundleno = 6 (0x6), region = 108 }
 0x293   :  { %972 = vsyncpa [#allocation3], 1 }
 0x294   :  { %974 = vsyncpa [#allocation3 + $0x1], 1 }

</bundles_post_ra>
